<compile_context>
chip_gen: v5e
topology: v5e:2x2
jax: 0.10.0
libtpu: 0.0.40
codegen_flags: <defaults>
</compile_context>

<pallas_src>
import math
import functools

import jax
import jax.numpy as jnp
from jax.experimental import pallas as pl
from jax.experimental.pallas import tpu as pltpu


def _round_up(x: int, m: int) -> int:
    return ((x + m - 1) // m) * m


def mlp_kernel(x_ref, w1_ref, w2_ref, w3_ref, b_ref, o_ref):
    # Hot path: 3 MXU matmuls (bf16 in, f32 accumulate). Hidden-layer epilogues
    # (bias + ReLU) run in bf16 to keep the VALU off the critical path on v6e/v7x.
    c_pad = o_ref.shape[1]

    x = x_ref[...].astype(jnp.bfloat16)                         # (tb, D)

    # fc1 + ReLU
    b1 = b_ref[0:1, :].astype(jnp.bfloat16)                     # (1, H_PAD)
    h1 = jnp.dot(x, w1_ref[...], preferred_element_type=jnp.float32)
    h1 = jnp.maximum(h1.astype(jnp.bfloat16) + b1, 0.0)         # bf16

    # fc2 + ReLU
    b2 = b_ref[1:2, :].astype(jnp.bfloat16)                     # (1, H_PAD)
    h2 = jnp.dot(h1, w2_ref[...], preferred_element_type=jnp.float32)
    h2 = jnp.maximum(h2.astype(jnp.bfloat16) + b2, 0.0)         # bf16

    # fc3 (no activation); keep f32 bias-add and f32 store for the logits.
    b3 = b_ref[2:3, :c_pad]                                      # (1, C_PAD) f32
    out = jnp.dot(h2, w3_ref[...], preferred_element_type=jnp.float32) + b3
    o_ref[...] = out.astype(o_ref.dtype)


def _choose_batch_tile(B: int, tile_b: int = 1024, min_grid: int = 2) -> int:
    """Sublane-aligned batch tile: amortize per-step overhead (~0.35us/step),
    keep >=2 grid steps for large B (v7x megacore), and limit padded-row waste."""
    b8 = _round_up(B, 8)
    if b8 <= 16:                       # tiny demo batches: one small tile
        return b8
    n_steps = max(min_grid, -(-B // tile_b))
    return _round_up(-(-B // n_steps), 8)


def simple_mlp_forward_padded(x, packed, *, tile_b=1024):
    """Runs the fused MLP on padded params. Returns (B_pad, C_PAD) f32."""
    w1, w2, w3, b = packed
    B, D = x.shape
    H_PAD = w1.shape[1]
    C_PAD = w3.shape[1]

    tb = _choose_batch_tile(B, tile_b)
    B_pad = _round_up(B, tb)
    if B_pad != B:
        x = jnp.pad(x, ((0, B_pad - B), (0, 0)))

    grid = (B_pad // tb,)

    flops = 2 * B_pad * (D * H_PAD + H_PAD * H_PAD + H_PAD * C_PAD)
    bytes_accessed = (
        B_pad * D * 4                      # x (f32)
        + (w1.size + w2.size + w3.size) * 2  # bf16 weights
        + b.size * 4                        # f32 biases
        + B_pad * C_PAD * 4                 # f32 output
    )

    out = pl.pallas_call(
        mlp_kernel,
        out_shape=jax.ShapeDtypeStruct((B_pad, C_PAD), jnp.float32),
        grid=grid,
        in_specs=[
            pl.BlockSpec((tb, D), lambda i: (i, 0)),          # x: streamed over batch
            pl.BlockSpec((D, H_PAD), lambda i: (0, 0)),       # w1: VMEM-resident
            pl.BlockSpec((H_PAD, H_PAD), lambda i: (0, 0)),   # w2: VMEM-resident
            pl.BlockSpec((H_PAD, C_PAD), lambda i: (0, 0)),   # w3: VMEM-resident
            pl.BlockSpec((3, H_PAD), lambda i: (0, 0)),       # biases: VMEM-resident
        ],
        out_specs=pl.BlockSpec((tb, C_PAD), lambda i: (i, 0)),
        compiler_params=pltpu.CompilerParams(
            dimension_semantics=("parallel",),
            vmem_limit_bytes=32 * 1024 * 1024,
        ),
        cost_estimate=pl.CostEstimate(
            flops=flops, bytes_accessed=bytes_accessed, transcendentals=0
        ),
    )(x, w1, w2, w3, b)
    return out


def simple_mlp_forward(x, logical_params, packed_params, *, tile_b=1024):
    """Full forward with slicing back to logical (B, num_classes)."""
    w3 = logical_params[4]
    num_classes = w3.shape[1]
    B = x.shape[0]
    out = simple_mlp_forward_padded(x, packed_params, tile_b=tile_b)
    return out[:B, :num_classes]


def init_linear(key, in_features, out_features):
    # Deterministic init mimicking PyTorch nn.Linear default (uniform +/- 1/sqrt(fan_in)).
    # Weight stored (in, out), i.e. transposed vs. PyTorch's (out, in); bias (out,).
    kw, kb = jax.random.split(key)
    bound = 1.0 / math.sqrt(in_features)
    w = jax.random.uniform(kw, (in_features, out_features), jnp.float32, -bound, bound)
    b = jax.random.uniform(kb, (out_features,), jnp.float32, -bound, bound)
    return w, b


def pack_params(logical_params):
    """Zero-pad hidden/classes to lane-aligned sizes, cast weights to bf16,
    and fuse the three biases into one (3, H_PAD) f32 array (fewer tiny DMAs).
    D (input dim) is intentionally NOT padded."""
    w1, b1, w2, b2, w3, b3 = logical_params
    D, H = w1.shape
    C = w3.shape[1]
    H_PAD = _round_up(H, 128)
    C_PAD = _round_up(C, 128)

    w1p = jnp.zeros((D, H_PAD), jnp.float32).at[:, :H].set(w1).astype(jnp.bfloat16)
    w2p = jnp.zeros((H_PAD, H_PAD), jnp.float32).at[:H, :H].set(w2).astype(jnp.bfloat16)
    w3p = jnp.zeros((H_PAD, C_PAD), jnp.float32).at[:H, :C].set(w3).astype(jnp.bfloat16)

    b = jnp.zeros((3, H_PAD), jnp.float32)
    b = b.at[0, :H].set(b1).at[1, :H].set(b2).at[2, :C].set(b3)
    return (w1p, w2p, w3p, b)


if __name__ == "__main__":
    num_classes = 10
    input_dim = 32
    batch = 8
    hidden = 500

    root = jax.random.PRNGKey(0)
    kx, k1, k2, k3 = jax.random.split(root, 4)

    x = jax.random.normal(kx, (batch, input_dim), jnp.float32)
    w1, b1 = init_linear(k1, input_dim, hidden)
    w2, b2 = init_linear(k2, hidden, hidden)
    w3, b3 = init_linear(k3, hidden, num_classes)
    logical_params = (w1, b1, w2, b2, w3, b3)
    packed_params = pack_params(logical_params)

    fwd = jax.jit(functools.partial(simple_mlp_forward, tile_b=1024))
    out = fwd(x, logical_params, packed_params)
    out = jax.block_until_ready(out)

    # Pure-JAX f32 reference on the unpadded params (bf16 weights + bf16 hidden-layer
    # epilogue in the kernel -> loosened tolerance).
    ref = jnp.maximum(x @ w1 + b1[None, :], 0.0)
    ref = jnp.maximum(ref @ w2 + b2[None, :], 0.0)
    ref = ref @ w3 + b3[None, :]

    assert out.shape == (batch, num_classes)
    assert jnp.allclose(out, ref, atol=3e-2, rtol=3e-2), (
        float(jnp.max(jnp.abs(out - ref)))
    )

    print("KERNEL_OK")
</pallas_src>

<mosaic_0001>
module attributes {stable_mosaic.version = 11 : i64} {
  func.func @mlp_kernel(%arg0: i32, %arg1: memref<8x32xf32, #tpu.memory_space<vmem>>, %arg2: memref<32x512xbf16, #tpu.memory_space<vmem>>, %arg3: memref<512x512xbf16, #tpu.memory_space<vmem>>, %arg4: memref<512x128xbf16, #tpu.memory_space<vmem>>, %arg5: memref<3x512xf32, #tpu.memory_space<vmem>>, %arg6: memref<8x128xf32, #tpu.memory_space<vmem>>) attributes {dimension_semantics = [#tpu.dimension_semantics<parallel>], iteration_bounds = array<i64: 1>, scalar_prefetch = 0 : i64, scratch_operands = 0 : i64, tpu.core_type = #tpu.core_type<tc>, window_params = [{transform_indices = @transform_0, window_bounds = array<i64: 8, 32>}, {pipeline_mode = #tpu.pipeline_mode<synchronous>, transform_indices = @transform_1, window_bounds = array<i64: 32, 512>}, {pipeline_mode = #tpu.pipeline_mode<synchronous>, transform_indices = @transform_2, window_bounds = array<i64: 512, 512>}, {pipeline_mode = #tpu.pipeline_mode<synchronous>, transform_indices = @transform_3, window_bounds = array<i64: 512, 128>}, {pipeline_mode = #tpu.pipeline_mode<synchronous>, transform_indices = @transform_4, window_bounds = array<i64: 3, 512>}, {transform_indices = @transform_5, window_bounds = array<i64: 8, 128>}]} {
    %c0 = arith.constant 0 : index
    %c0_0 = arith.constant 0 : index
    %0 = vector.load %arg1[%c0, %c0_0] : memref<8x32xf32, #tpu.memory_space<vmem>>, vector<8x32xf32>
    %1 = arith.truncf %0 : vector<8x32xf32> to vector<8x32xbf16>
    %c0_1 = arith.constant 0 : index
    %c0_2 = arith.constant 0 : index
    %2 = vector.load %arg5[%c0_1, %c0_2] : memref<3x512xf32, #tpu.memory_space<vmem>>, vector<1x512xf32>
    %3 = arith.truncf %2 : vector<1x512xf32> to vector<1x512xbf16>
    %c0_3 = arith.constant 0 : index
    %c0_4 = arith.constant 0 : index
    %4 = vector.load %arg2[%c0_3, %c0_4] : memref<32x512xbf16, #tpu.memory_space<vmem>>, vector<32x512xbf16>
    %cst = arith.constant dense<0.000000e+00> : vector<8x512xf32>
    %5 = tpu.matmul %1, %4, %cst {dimension_numbers = #tpu.dot_dimension_numbers<[1], [0], [0], [1], [0, 0, 1, 1], [], []>} : vector<8x32xbf16>, vector<32x512xbf16>, vector<8x512xf32> -> vector<8x512xf32>
    %6 = arith.truncf %5 : vector<8x512xf32> to vector<8x512xbf16>
    %7 = vector.broadcast %3 : vector<1x512xbf16> to vector<8x512xbf16>
    %8 = arith.addf %6, %7 : vector<8x512xbf16>
    %cst_5 = arith.constant 0.000000e+00 : bf16
    %9 = vector.broadcast %cst_5 : bf16 to vector<8x512xbf16>
    %10 = arith.maximumf %8, %9 : vector<8x512xbf16>
    %c1 = arith.constant 1 : index
    %c0_6 = arith.constant 0 : index
    %11 = vector.load %arg5[%c1, %c0_6] : memref<3x512xf32, #tpu.memory_space<vmem>>, vector<1x512xf32>
    %12 = arith.truncf %11 : vector<1x512xf32> to vector<1x512xbf16>
    %c0_7 = arith.constant 0 : index
    %c0_8 = arith.constant 0 : index
    %13 = vector.load %arg3[%c0_7, %c0_8] : memref<512x512xbf16, #tpu.memory_space<vmem>>, vector<512x512xbf16>
    %cst_9 = arith.constant dense<0.000000e+00> : vector<8x512xf32>
    %14 = tpu.matmul %10, %13, %cst_9 {dimension_numbers = #tpu.dot_dimension_numbers<[1], [0], [0], [1], [0, 0, 1, 1], [], []>} : vector<8x512xbf16>, vector<512x512xbf16>, vector<8x512xf32> -> vector<8x512xf32>
    %15 = arith.truncf %14 : vector<8x512xf32> to vector<8x512xbf16>
    %16 = vector.broadcast %12 : vector<1x512xbf16> to vector<8x512xbf16>
    %17 = arith.addf %15, %16 : vector<8x512xbf16>
    %cst_10 = arith.constant 0.000000e+00 : bf16
    %18 = vector.broadcast %cst_10 : bf16 to vector<8x512xbf16>
    %19 = arith.maximumf %17, %18 : vector<8x512xbf16>
    %c2 = arith.constant 2 : index
    %c0_11 = arith.constant 0 : index
    %20 = vector.load %arg5[%c2, %c0_11] : memref<3x512xf32, #tpu.memory_space<vmem>>, vector<1x128xf32>
    %c0_12 = arith.constant 0 : index
    %c0_13 = arith.constant 0 : index
    %21 = vector.load %arg4[%c0_12, %c0_13] : memref<512x128xbf16, #tpu.memory_space<vmem>>, vector<512x128xbf16>
    %cst_14 = arith.constant dense<0.000000e+00> : vector<8x128xf32>
    %22 = tpu.matmul %19, %21, %cst_14 {dimension_numbers = #tpu.dot_dimension_numbers<[1], [0], [0], [1], [0, 0, 1, 1], [], []>} : vector<8x512xbf16>, vector<512x128xbf16>, vector<8x128xf32> -> vector<8x128xf32>
    %23 = vector.broadcast %20 : vector<1x128xf32> to vector<8x128xf32>
    %24 = arith.addf %22, %23 : vector<8x128xf32>
    %c0_15 = arith.constant 0 : index
    %c0_16 = arith.constant 0 : index
    %25 = vector.load %arg6[%c0_15, %c0_16] : memref<8x128xf32, #tpu.memory_space<vmem>>, vector<8x128xf32>
    tpu.vector_store %arg6[%c0_15, %c0_16], %24 {strides = array<i32>} : memref<8x128xf32, #tpu.memory_space<vmem>>, vector<8x128xf32>,
    return
  }
  func.func @transform_0(%arg0: i32) -> (i32, i32) {
    %c0_i32 = arith.constant 0 : i32
    %c0_i32_0 = arith.constant 0 : i32
    return %arg0, %c0_i32 : i32, i32
  }
  func.func @transform_1(%arg0: i32) -> (i32, i32) {
    %c0_i32 = arith.constant 0 : i32
    %c0_i32_0 = arith.constant 0 : i32
    %c0_i32_1 = arith.constant 0 : i32
    return %c0_i32, %c0_i32_0 : i32, i32
  }
  func.func @transform_2(%arg0: i32) -> (i32, i32) {
    %c0_i32 = arith.constant 0 : i32
    %c0_i32_0 = arith.constant 0 : i32
    %c0_i32_1 = arith.constant 0 : i32
    return %c0_i32, %c0_i32_0 : i32, i32
  }
  func.func @transform_3(%arg0: i32) -> (i32, i32) {
    %c0_i32 = arith.constant 0 : i32
    %c0_i32_0 = arith.constant 0 : i32
    %c0_i32_1 = arith.constant 0 : i32
    return %c0_i32, %c0_i32_0 : i32, i32
  }
  func.func @transform_4(%arg0: i32) -> (i32, i32) {
    %c0_i32 = arith.constant 0 : i32
    %c0_i32_0 = arith.constant 0 : i32
    %c0_i32_1 = arith.constant 0 : i32
    return %c0_i32, %c0_i32_0 : i32, i32
  }
  func.func @transform_5(%arg0: i32) -> (i32, i32) {
    %c0_i32 = arith.constant 0 : i32
    %c0_i32_0 = arith.constant 0 : i32
    return %arg0, %c0_i32 : i32, i32
  }
}

</mosaic_0001>

<bundles_post_ra>
// kernel: simple_mlp_forward.1
= control target key start
LH: loop header
LB: loop body
LE: loop exit
PB: predicated region body
PF: predicated region fallthrough
CT: control target
= control target key end

     0   :  { %10 = vsyncpa [#allocation3], 0  ;;  %s2740_s0 = inlined_call_operand.hbm [shape: f32[8,32], index: 0, kind: input, shape index: {}]   ;;  %s2741_s1 = inlined_call_operand.hbm [shape: bf16[32,512], index: 1, kind: input, shape index: {}]   ;;  %s2742_s2 = inlined_call_operand.hbm [shape: bf16[512,512], index: 2, kind: input, shape index: {}]   ;;  %s2743_s3 = inlined_call_operand.hbm [shape: bf16[512,128], index: 3, kind: input, shape index: {}]   ;;  %s2744_s4 = inlined_call_operand.hbm [shape: f32[3,512], index: 4, kind: input, shape index: {}]   ;;  %s2745_s5 = inlined_call_operand.hbm [shape: f32[8,128], index: 5, kind: output, shape index: {}]  }
   0x1   :  { %11 = vsyncpa [#allocation6], 0 }
   0x2   :  { %12 = vsyncpa [#allocation9], 0  ;;  %s29_s20 = sshll.u32 %s2741_s1, 4  ;;  %s30_s20 = int_to_ptr.hbm [resolvable:$true] %s29_s20 }
   0x3   :  { %13 = vsyncpa [#allocation4], 0  ;;  %s2648_s21 = smov [#allocation5]   ;;  %s55_s25 = sshll.u32 %s2743_s3, 4  ;;  %s56_s25 = int_to_ptr.hbm [resolvable:$true] %s55_s25 }
   0x4   :  { %s31_s22 = sshll.u32 %s2648_s21, 4  ;;  %s2649_s26 = smov 256   ;;  %s32_s22 = int_to_ptr.vmem [resolvable:$true] %s31_s22 }
   0x5   :  { %s2650_s27 = smov 16   ;;  %s2651_s28 = smov [#allocation8]  }
   0x6   :  { %37 = dma.hbm_to_vmem [thread:$0]  %s30_s20, 1024, %s32_s22, [#allocation6], %s2649_s26, %s2649_s26, %s2650_s27  }
   0x7   :  { %s57_s29 = sshll.u32 %s2651_s28, 4  ;;  %s2652_s30 = smov 64   ;;  %s58_s29 = int_to_ptr.vmem [resolvable:$true] %s57_s29 }
   0x8   :  { %s2653_s6 = smov 4   ;;  %s19_s8 = sshll.u32 %s2740_s0, 4  ;;  %s20_s8 = int_to_ptr.hbm [resolvable:$true] %s19_s8 }
   0x9   :  { %63 = dma.hbm_to_vmem [thread:$0]  %s56_s25, 4096, %s58_s29, [#allocation9], %s2652_s30, %s2652_s30, %s2653_s6  }
   0xa   :  { %s2654_s9 = smov [#allocation2]   ;;  %s42_s12 = sshll.u32 %s2742_s2, 4  ;;  %s43_s12 = int_to_ptr.hbm [resolvable:$true] %s42_s12 }
   0xb   :  { %s21_s10 = sshll.u32 %s2654_s9, 4  ;;  %s2655_s13 = smov [#allocation7]   ;;  %s22_s10 = int_to_ptr.vmem [resolvable:$true] %s21_s10 }
   0xc   :  { %24 = dma.hbm_to_vmem [thread:$0]  %s20_s8, 128, %s22_s10, [#allocation3]  }
   0xd   :  { %s44_s14 = sshll.u32 %s2655_s13, 4  ;;  %s69_s17 = sshll.u32 %s2744_s4, 4  ;;  %s45_s14 = int_to_ptr.vmem [resolvable:$true] %s44_s14  ;;  %s70_s17 = int_to_ptr.hbm [resolvable:$true] %s69_s17 }
   0xe   :  { %50 = dma.hbm_to_vmem [thread:$0]  %s43_s12, 16384, %s45_s14, [#allocation6], %s2649_s26, %s2649_s26, %s2650_s27  }
   0xf   :  { %s2656_s0 = smov [#allocation10]  }
  0x10   :  { %s71_s18 = sshll.u32 %s2656_s0, 4  ;;  %s72_s18 = int_to_ptr.vmem [resolvable:$true] %s71_s18 }
  0x11   :  { %74 = dma.hbm_to_vmem [thread:$0]  %s70_s17, 256, %s72_s18, [#allocation9]  }
  0x12   :  { %2640 = dma.done.wait [#allocation3], 128  }
  0x13   :  { %2641 = vsyncadd [#allocation3], 4294967168 }
  0x14   :  { %2642 = dma.done.wait [#allocation6], 17408  }
  0x15   :  { %2643 = vsyncadd [#allocation6], 4294949888 }
  0x16   :  { %2644 = dma.done.wait [#allocation9], 4352  }
  0x17   :  { %2645 = vsyncadd [#allocation9], 4294962944  ;;  %v1659_v0 = vld [vmem:[#allocation5 + $0x20] sm:$0xf]  ;;  %v2323_v1 = vld [vmem:[#allocation5 + $0x2c] sm:$0xf0] }
  0x18   :  { %v2321_v2 = vld [vmem:[#allocation5 + $0x24] sm:$0xf]  ;;  %v1660_v3 = vor.u32 %v2323_v1, %v1659_v0  ;;  %v1661_v4 = vld [vmem:[#allocation5 + $0x30] sm:$0xf0]  ;;  %v1667_v5 = vld [vmem:[#allocation5 + $0x28] sm:$0xf] }
  0x19   :  { %v2324_v6 = vld [vmem:[#allocation5 + $0x34] sm:$0xf0]  ;;  %v1664_v7 = vor.u32 %v2321_v2, %v1661_v4  ;;  %v2322_v9 = vld [vmem:[#allocation5 + $0x2c] sm:$0xf]  ;;  %v1669_v10 = vld [vmem:[#allocation5 + $0x38] sm:$0xf0] }
  0x1a   :  { %v1668_v8 = vor.u32 %v2324_v6, %v1667_v5  ;;  %v1643_v11 = vld [vmem:[#allocation5] sm:$0xf]  ;;  %168 = vmatpush.bf16.msra.mxu0 %v1660_v3  ;;  %v1672_v12 = vor.u32 %v2322_v9, %v1669_v10  ;;  %v2319_v13 = vld [vmem:[#allocation5 + $0xc] sm:$0xf0]  ;;  %v2317_v14 = vld [vmem:[#allocation5 + $0x4] sm:$0xf] }
  0x1b   :  { %v1645_v15 = vld [vmem:[#allocation5 + $0x10] sm:$0xf0]  ;;  %181 = vmatpush.bf16.msra.mxu1 %v1664_v7  ;;  %v1644_v16 = vor.u32 %v2319_v13, %v1643_v11  ;;  %v1651_v18 = vld [vmem:[#allocation5 + $0x8] sm:$0xf]  ;;  %v2320_v19 = vld [vmem:[#allocation5 + $0x14] sm:$0xf0] }
  0x1c   :  { %194 = vmatpush.bf16.msra.mxu2 %v1668_v8  ;;  %v1648_v17 = vor.u32 %v2317_v14, %v1645_v15  ;;  %v2318_v20 = vld [vmem:[#allocation5 + $0xc] sm:$0xf]  ;;  %207 = vmatpush.bf16.msra.mxu3 %v1672_v12  ;;  %v1652_v21 = vor.u32 %v2320_v19, %v1651_v18  ;;  %v1653_v22 = vld [vmem:[#allocation5 + $0x18] sm:$0xf0]  ;;  %vm158_vm0 = vcmask 261120   ;;  %s2657_s2 = smov [#allocation11]  }
  0x1d   :  { %v96_v23 = vld [vmem:[#allocation2] sm:$0xff]  ;;  %v1791_v24 = vld [vmem:[#allocation7 + $0xe0] sm:$0xf]  ;;  %v1656_v25 = vor.u32 %v2318_v20, %v1653_v22  ;;  %v2355_v27 = vld [vmem:[#allocation7 + $0xec] sm:$0xf0]  ;;  %s1627_s4 = sshll.u32 %s2657_s2, 4  ;;  %s1628_s4 = int_to_ptr.vmem [resolvable:$true] %s1627_s4 }
  0x1e   :  { %v97_v26 = vpack.c.bf16 %v96_v23, %v96_v23  ;;  %v1919_v28 = vld [vmem:[#allocation7 + $0x1e0] sm:$0xf]  ;;  %v2387_v29 = vld [vmem:[#allocation7 + $0x1ec] sm:$0xf0]  ;;  %169 = vmatpush.bf16.msra.mxu0 %v1644_v16  ;;  %v1792_v30 = vor.u32 %v2355_v27, %v1791_v24  ;;  %s1629_s21 = sshll.u32 %s2745_s5, 4  ;;  %s1630_s21 = int_to_ptr.hbm [resolvable:$true] %s1629_s21 }
  0x1f   :  { %v1920_v31 = vor.u32 %v2387_v29, %v1919_v28  ;;  %v1775_v32 = vld [vmem:[#allocation7 + $0xc0] sm:$0xf]  ;;  %v2351_v33 = vld [vmem:[#allocation7 + $0xcc] sm:$0xf0]  ;;  %182 = vmatpush.bf16.msra.mxu1 %v1648_v17 }
  0x20   :  { %v1903_v34 = vld [vmem:[#allocation7 + $0x1c0] sm:$0xf]  ;;  %195 = vmatpush.bf16.msra.mxu2 %v1652_v21  ;;  %v2383_v35 = vld [vmem:[#allocation7 + $0x1cc] sm:$0xf0]  ;;  %208 = vmatpush.bf16.msra.mxu3 %v1656_v25  ;;  %v1776_v38 = vor.u32 %v2351_v33, %v1775_v32 }
  0x21   :  { %v2047_v36 = vld [vmem:[#allocation7 + $0x2e0] sm:$0xf]  ;;  %v2419_v37 = vld [vmem:[#allocation7 + $0x2ec] sm:$0xf0]  ;;  %1673 = vmatmul.msk.bf16.vlgmr.msra.gmra.mxu0 %vm158_vm0, %v97_v26  ;;  %v1904_v43 = vor.u32 %v2383_v35, %v1903_v34 }
  0x22   :  { %1049 = vmatpush.bf16.msrb.mxu0 %v1792_v30  ;;  %v2048_v39 = vor.u32 %v2419_v37, %v2047_v36  ;;  %v2175_v40 = vld [vmem:[#allocation7 + $0x3e0] sm:$0xf]  ;;  %v2451_v41 = vld [vmem:[#allocation7 + $0x3ec] sm:$0xf0]  ;;  %1674 = vmatmul.msk.bf16.vlgmr.msra.gmra.mxu1 %vm158_vm0, %v97_v26 }
  0x23   :  { %v1759_v42 = vld [vmem:[#allocation7 + $0xa0] sm:$0xf]  ;;  %1062 = vmatpush.bf16.msrb.mxu1 %v1920_v31  ;;  %v2176_v44 = vor.u32 %v2451_v41, %v2175_v40  ;;  %v2347_v45 = vld [vmem:[#allocation7 + $0xac] sm:$0xf0]  ;;  %1675 = vmatmul.msk.bf16.vlgmr.msra.gmra.mxu2 %vm158_vm0, %v97_v26 }
  0x24   :  { %v1887_v46 = vld [vmem:[#allocation7 + $0x1a0] sm:$0xf]  ;;  %v2379_v47 = vld [vmem:[#allocation7 + $0x1ac] sm:$0xf0]  ;;  %1676 = vmatmul.msk.bf16.vlgmr.msra.gmra.mxu3 %vm158_vm0, %v97_v26  ;;  %1075 = vmatpush.bf16.msrb.mxu2 %v2048_v39  ;;  %v1760_v53 = vor.u32 %v2347_v45, %v1759_v42 }
  0x25   :  { %v2031_v48 = vld [vmem:[#allocation7 + $0x2c0] sm:$0xf]  ;;  %v2415_v49 = vld [vmem:[#allocation7 + $0x2cc] sm:$0xf0]  ;;  %1088 = vmatpush.bf16.msrb.mxu3 %v2176_v44  ;;  %v1888_v58 = vor.u32 %v2379_v47, %v1887_v46 }
  0x26   :  { %v2159_v50 = vld [vmem:[#allocation7 + $0x3c0] sm:$0xf]  ;;  %v2032_v51 = vor.u32 %v2415_v49, %v2031_v48  ;;  %v2447_v52 = vld [vmem:[#allocation7 + $0x3cc] sm:$0xf0]  ;;  %1050 = vmatpush.bf16.msrb.mxu0 %v1776_v38  ;;  %v2353_v48 = vld [vmem:[#allocation7 + $0xe4] sm:$0xf] }
  0x27   :  { %v2160_v54 = vor.u32 %v2447_v52, %v2159_v50  ;;  %v1743_v55 = vld [vmem:[#allocation7 + $0x80] sm:$0xf]  ;;  %v2343_v56 = vld [vmem:[#allocation7 + $0x8c] sm:$0xf0]  ;;  %1063 = vmatpush.bf16.msrb.mxu1 %v1904_v43  ;;  %v1793_v49 = vld [vmem:[#allocation7 + $0xf0] sm:$0xf0] }
  0x28   :  { %v2015_v57 = vld [vmem:[#allocation7 + $0x2a0] sm:$0xf]  ;;  %v2411_v59 = vld [vmem:[#allocation7 + $0x2ac] sm:$0xf0]  ;;  %1076 = vmatpush.bf16.msrb.mxu2 %v2032_v51  ;;  %v1744_v1 = vor.u32 %v2343_v56, %v1743_v55  ;;  %v2385_v50 = vld [vmem:[#allocation7 + $0x1e4] sm:$0xf] }
  0x29   :  { %v2143_v60 = vld [vmem:[#allocation7 + $0x3a0] sm:$0xf]  ;;  %v2443_v61 = vld [vmem:[#allocation7 + $0x3ac] sm:$0xf0]  ;;  %v2016_v0 = vor.u32 %v2411_v59, %v2015_v57  ;;  %1089 = vmatpush.bf16.msrb.mxu3 %v2160_v54  ;;  %v1921_v51 = vld [vmem:[#allocation7 + $0x1f0] sm:$0xf0] }
  0x2a   :  { %v1871_v62 = vld [vmem:[#allocation7 + $0x180] sm:$0xf]  ;;  %v2375_v63 = vld [vmem:[#allocation7 + $0x18c] sm:$0xf0]  ;;  %1051 = vmatpush.bf16.msrb.mxu0 %v1760_v53  ;;  %v2144_v2 = vor.u32 %v2443_v61, %v2143_v60  ;;  %v2349_v55 = vld [vmem:[#allocation7 + $0xc4] sm:$0xf]  ;;  %v1796_v60 = vor.u32 %v2353_v48, %v1793_v49 }
  0x2b   :  { %v1727_v3 = vld [vmem:[#allocation7 + $0x60] sm:$0xf]  ;;  %v2407_v5 = vld [vmem:[#allocation7 + $0x28c] sm:$0xf0]  ;;  %1064 = vmatpush.bf16.msrb.mxu1 %v1888_v58  ;;  %v1872_v6 = vor.u32 %v2375_v63, %v1871_v62  ;;  %v2417_v62 = vld [vmem:[#allocation7 + $0x2e4] sm:$0xf] }
  0x2c   :  { %v1999_v4 = vld [vmem:[#allocation7 + $0x280] sm:$0xf]  ;;  %v2339_v7 = vld [vmem:[#allocation7 + $0x6c] sm:$0xf0]  ;;  %1077 = vmatpush.bf16.msrb.mxu2 %v2016_v0  ;;  %v2049_v63 = vld [vmem:[#allocation7 + $0x2f0] sm:$0xf0]  ;;  %v1924_v0 = vor.u32 %v2385_v50, %v1921_v51 }
  0x2d   :  { %v2127_v8 = vld [vmem:[#allocation7 + $0x380] sm:$0xf]  ;;  %v2439_v9 = vld [vmem:[#allocation7 + $0x38c] sm:$0xf0]  ;;  %v2000_v12 = vor.u32 %v2407_v5, %v1999_v4  ;;  %1090 = vmatpush.bf16.msrb.mxu3 %v2144_v2  ;;  %v1728_v13 = vor.u32 %v2339_v7, %v1727_v3  ;;  %v2449_v2 = vld [vmem:[#allocation7 + $0x3e4] sm:$0xf] }
  0x2e   :  { %v1855_v10 = vld [vmem:[#allocation7 + $0x160] sm:$0xf]  ;;  %v2371_v11 = vld [vmem:[#allocation7 + $0x16c] sm:$0xf0]  ;;  %1052 = vmatpush.bf16.msrb.mxu0 %v1744_v1  ;;  %v2128_v14 = vor.u32 %v2439_v9, %v2127_v8  ;;  %v1777_v1 = vld [vmem:[#allocation7 + $0xd0] sm:$0xf0]  ;;  %v2052_v8 = vor.u32 %v2417_v62, %v2049_v63 }
  0x2f   :  { %v1711_v15 = vld [vmem:[#allocation7 + $0x40] sm:$0xf]  ;;  %v2403_v17 = vld [vmem:[#allocation7 + $0x26c] sm:$0xf0]  ;;  %1065 = vmatpush.bf16.msrb.mxu1 %v1872_v6  ;;  %v1856_v18 = vor.u32 %v2371_v11, %v1855_v10  ;;  %v2177_v3 = vld [vmem:[#allocation7 + $0x3f0] sm:$0xf0]  ;;  %v1780_v9 = vor.u32 %v2349_v55, %v1777_v1 }
  0x30   :  { %v1983_v16 = vld [vmem:[#allocation7 + $0x260] sm:$0xf]  ;;  %v2335_v19 = vld [vmem:[#allocation7 + $0x4c] sm:$0xf0]  ;;  %1078 = vmatpush.bf16.msrb.mxu2 %v2000_v12  ;;  %v2381_v4 = vld [vmem:[#allocation7 + $0x1c4] sm:$0xf]  ;;  %v2180_v10 = vor.u32 %v2449_v2, %v2177_v3 }
  0x31   :  { %v2111_v20 = vld [vmem:[#allocation7 + $0x360] sm:$0xf]  ;;  %v2435_v21 = vld [vmem:[#allocation7 + $0x36c] sm:$0xf0]  ;;  %v1984_v24 = vor.u32 %v2403_v17, %v1983_v16  ;;  %1091 = vmatpush.bf16.msrb.mxu3 %v2128_v14  ;;  %v1712_v25 = vor.u32 %v2335_v19, %v1711_v15  ;;  %v1905_v5 = vld [vmem:[#allocation7 + $0x1d0] sm:$0xf0] }
  0x32   :  { %v1839_v22 = vld [vmem:[#allocation7 + $0x140] sm:$0xf]  ;;  %v2367_v23 = vld [vmem:[#allocation7 + $0x14c] sm:$0xf0]  ;;  %1053 = vmatpush.bf16.msrb.mxu0 %v1728_v13  ;;  %v2112_v26 = vor.u32 %v2435_v21, %v2111_v20  ;;  %v2345_v11 = vld [vmem:[#allocation7 + $0xa4] sm:$0xf]  ;;  %v1908_v14 = vor.u32 %v2381_v4, %v1905_v5 }
  0x33   :  { %v1695_v27 = vld [vmem:[#allocation7 + $0x20] sm:$0xf]  ;;  %v2399_v29 = vld [vmem:[#allocation7 + $0x24c] sm:$0xf0]  ;;  %1066 = vmatpush.bf16.msrb.mxu1 %v1856_v18  ;;  %v1840_v30 = vor.u32 %v2367_v23, %v1839_v22  ;;  %v2413_v12 = vld [vmem:[#allocation7 + $0x2c4] sm:$0xf] }
  0x34   :  { %v1967_v28 = vld [vmem:[#allocation7 + $0x240] sm:$0xf]  ;;  %v2331_v31 = vld [vmem:[#allocation7 + $0x2c] sm:$0xf0]  ;;  %1079 = vmatpush.bf16.msrb.mxu2 %v1984_v24  ;;  %v2033_v13 = vld [vmem:[#allocation7 + $0x2d0] sm:$0xf0] }
  0x35   :  { %v2095_v32 = vld [vmem:[#allocation7 + $0x340] sm:$0xf]  ;;  %v2431_v33 = vld [vmem:[#allocation7 + $0x34c] sm:$0xf0]  ;;  %v1968_v36 = vor.u32 %v2399_v29, %v1967_v28  ;;  %1092 = vmatpush.bf16.msrb.mxu3 %v2112_v26  ;;  %v1696_v38 = vor.u32 %v2331_v31, %v1695_v27  ;;  %v1761_v15 = vld [vmem:[#allocation7 + $0xb0] sm:$0xf0]  ;;  %v2036_v20 = vor.u32 %v2413_v12, %v2033_v13 }
  0x36   :  { %v1823_v34 = vld [vmem:[#allocation7 + $0x120] sm:$0xf]  ;;  %v2363_v35 = vld [vmem:[#allocation7 + $0x12c] sm:$0xf0]  ;;  %1054 = vmatpush.bf16.msrb.mxu0 %v1712_v25  ;;  %v2096_v39 = vor.u32 %v2431_v33, %v2095_v32  ;;  %v2445_v16 = vld [vmem:[#allocation7 + $0x3c4] sm:$0xf]  ;;  %v1764_v21 = vor.u32 %v2345_v11, %v1761_v15 }
  0x37   :  { %v1679_v37 = vld [vmem:[#allocation7] sm:$0xf]  ;;  %v2327_v40 = vld [vmem:[#allocation7 + $0xc] sm:$0xf0]  ;;  %1067 = vmatpush.bf16.msrb.mxu1 %v1840_v30  ;;  %v1824_v43 = vor.u32 %v2363_v35, %v1823_v34  ;;  %v2161_v17 = vld [vmem:[#allocation7 + $0x3d0] sm:$0xf0] }
  0x38   :  { %v1951_v41 = vld [vmem:[#allocation7 + $0x220] sm:$0xf]  ;;  %v2395_v42 = vld [vmem:[#allocation7 + $0x22c] sm:$0xf0]  ;;  %1080 = vmatpush.bf16.msrb.mxu2 %v1968_v36  ;;  %v1680_v53 = vor.u32 %v2327_v40, %v1679_v37  ;;  %v2377_v18 = vld [vmem:[#allocation7 + $0x1a4] sm:$0xf]  ;;  %v2164_v22 = vor.u32 %v2445_v16, %v2161_v17 }
  0x39   :  { %v1807_v44 = vld [vmem:[#allocation7 + $0x100] sm:$0xf]  ;;  %v2427_v46 = vld [vmem:[#allocation7 + $0x32c] sm:$0xf0]  ;;  %v1952_v52 = vor.u32 %v2395_v42, %v1951_v41  ;;  %1093 = vmatpush.bf16.msrb.mxu3 %v2096_v39  ;;  %v1889_v19 = vld [vmem:[#allocation7 + $0x1b0] sm:$0xf0] }
  0x3a   :  { %v2079_v45 = vld [vmem:[#allocation7 + $0x320] sm:$0xf]  ;;  %v2359_v47 = vld [vmem:[#allocation7 + $0x10c] sm:$0xf0]  ;;  %1055 = vmatpush.bf16.msrb.mxu0 %v1696_v38  ;;  %v2341_v23 = vld [vmem:[#allocation7 + $0x84] sm:$0xf]  ;;  %v1892_v26 = vor.u32 %v2377_v18, %v1889_v19 }
  0x3b   :  { %v2080_v54 = vor.u32 %v2427_v46, %v2079_v45  ;;  %v1935_v56 = vld [vmem:[#allocation7 + $0x200] sm:$0xf]  ;;  %v2391_v57 = vld [vmem:[#allocation7 + $0x20c] sm:$0xf0]  ;;  %1068 = vmatpush.bf16.msrb.mxu1 %v1824_v43  ;;  %v1808_v59 = vor.u32 %v2359_v47, %v1807_v44  ;;  %v2409_v24 = vld [vmem:[#allocation7 + $0x2a4] sm:$0xf] }
  0x3c   :  { %v2063_v58 = vld [vmem:[#allocation7 + $0x300] sm:$0xf]  ;;  %v2423_v61 = vld [vmem:[#allocation7 + $0x30c] sm:$0xf0]  ;;  %1081 = vmatpush.bf16.msrb.mxu2 %v1952_v52  ;;  %v1936_v6 = vor.u32 %v2391_v57, %v1935_v56  ;;  %v2017_v25 = vld [vmem:[#allocation7 + $0x2b0] sm:$0xf0] }
  0x3d   :  { %1094 = vmatpush.bf16.msrb.mxu3 %v2080_v54  ;;  %v2064_v7 = vor.u32 %v2423_v61, %v2063_v58  ;;  %v1745_v27 = vld [vmem:[#allocation7 + $0x90] sm:$0xf0]  ;;  %v2441_v28 = vld [vmem:[#allocation7 + $0x3a4] sm:$0xf]  ;;  %v2020_v32 = vor.u32 %v2409_v24, %v2017_v25 }
  0x3e   :  { %1056 = vmatpush.bf16.msrb.mxu0 %v1680_v53  ;;  %v2145_v29 = vld [vmem:[#allocation7 + $0x3b0] sm:$0xf0]  ;;  %v2373_v30 = vld [vmem:[#allocation7 + $0x184] sm:$0xf]  ;;  %v1748_v33 = vor.u32 %v2341_v23, %v1745_v27 }
  0x3f   :  { %1069 = vmatpush.bf16.msrb.mxu1 %v1808_v59  ;;  %v1873_v31 = vld [vmem:[#allocation7 + $0x190] sm:$0xf0]  ;;  %v2148_v34 = vor.u32 %v2441_v28, %v2145_v29  ;;  %v2337_v36 = vld [vmem:[#allocation7 + $0x64] sm:$0xf] }
  0x40   :  { %1082 = vmatpush.bf16.msrb.mxu2 %v1936_v6  ;;  %v1876_v35 = vor.u32 %v2373_v30, %v1873_v31  ;;  %v1729_v37 = vld [vmem:[#allocation7 + $0x70] sm:$0xf0]  ;;  %v2369_v38 = vld [vmem:[#allocation7 + $0x164] sm:$0xf] }
  0x41   :  { %1095 = vmatpush.bf16.msrb.mxu3 %v2064_v7  ;;  %v1857_v39 = vld [vmem:[#allocation7 + $0x170] sm:$0xf0]  ;;  %v1732_v40 = vor.u32 %v2337_v36, %v1729_v37  ;;  %v2405_v42 = vld [vmem:[#allocation7 + $0x284] sm:$0xf] }
  0x42   :  { %1101 = vmatpush.bf16.msra.mxu0 %v1796_v60  ;;  %v1860_v41 = vor.u32 %v2369_v38, %v1857_v39  ;;  %v2001_v43 = vld [vmem:[#allocation7 + $0x290] sm:$0xf0]  ;;  %v2437_v44 = vld [vmem:[#allocation7 + $0x384] sm:$0xf] }
  0x43   :  { %1114 = vmatpush.bf16.msra.mxu1 %v1924_v0  ;;  %v2004_v45 = vor.u32 %v2405_v42, %v2001_v43  ;;  %v2129_v46 = vld [vmem:[#allocation7 + $0x390] sm:$0xf0]  ;;  %v2333_v48 = vld [vmem:[#allocation7 + $0x44] sm:$0xf] }
  0x44   :  { %1127 = vmatpush.bf16.msra.mxu2 %v2052_v8  ;;  %v2132_v47 = vor.u32 %v2437_v44, %v2129_v46  ;;  %v1713_v49 = vld [vmem:[#allocation7 + $0x50] sm:$0xf0]  ;;  %v2365_v50 = vld [vmem:[#allocation7 + $0x144] sm:$0xf] }
  0x45   :  { %1140 = vmatpush.bf16.msra.mxu3 %v2180_v10  ;;  %v1716_v51 = vor.u32 %v2333_v48, %v1713_v49  ;;  %v1841_v52 = vld [vmem:[#allocation7 + $0x150] sm:$0xf0]  ;;  %v2401_v54 = vld [vmem:[#allocation7 + $0x264] sm:$0xf] }
  0x46   :  { %1102 = vmatpush.bf16.msra.mxu0 %v1780_v9  ;;  %v1844_v53 = vor.u32 %v2365_v50, %v1841_v52  ;;  %v1985_v55 = vld [vmem:[#allocation7 + $0x270] sm:$0xf0]  ;;  %v2433_v57 = vld [vmem:[#allocation7 + $0x364] sm:$0xf] }
  0x47   :  { %1115 = vmatpush.bf16.msra.mxu1 %v1908_v14  ;;  %v1988_v56 = vor.u32 %v2401_v54, %v1985_v55  ;;  %v2113_v58 = vld [vmem:[#allocation7 + $0x370] sm:$0xf0]  ;;  %v2329_v60 = vld [vmem:[#allocation7 + $0x24] sm:$0xf] }
  0x48   :  { %1128 = vmatpush.bf16.msra.mxu2 %v2036_v20  ;;  %v2116_v59 = vor.u32 %v2433_v57, %v2113_v58  ;;  %v1697_v61 = vld [vmem:[#allocation7 + $0x30] sm:$0xf0]  ;;  %v2361_v62 = vld [vmem:[#allocation7 + $0x124] sm:$0xf] }
  0x49   :  { %1141 = vmatpush.bf16.msra.mxu3 %v2164_v22  ;;  %v98_v63 = vld [vmem:[#allocation10] ss:$4 sm:$0xf]  ;;  %v1700_v0 = vor.u32 %v2329_v60, %v1697_v61  ;;  %v1825_v1 = vld [vmem:[#allocation7 + $0x130] sm:$0xf0] }
  0x4a   :  { %1103 = vmatpush.bf16.msra.mxu0 %v1764_v21  ;;  %v1828_v2 = vor.u32 %v2361_v62, %v1825_v1  ;;  %v2397_v3 = vld [vmem:[#allocation7 + $0x244] sm:$0xf]  ;;  %v1969_v4 = vld [vmem:[#allocation7 + $0x250] sm:$0xf0]  ;;  %v100_v12 = vperm.slane %v98_v63, 0  ;;  %v101_v13 = vperm.slane %v98_v63, 1 }
  0x4b   :  { %1116 = vmatpush.bf16.msra.mxu1 %v1892_v26  ;;  %v2429_v5 = vld [vmem:[#allocation7 + $0x344] sm:$0xf]  ;;  %v1972_v6 = vor.u32 %v2397_v3, %v1969_v4  ;;  %v2097_v7 = vld [vmem:[#allocation7 + $0x350] sm:$0xf0]  ;;  %v102_v26 = vperm.slane %v98_v63, 2  ;;  %v103_v27 = vperm.slane %v98_v63, 3 }
  0x4c   :  { %1129 = vmatpush.bf16.msra.mxu2 %v2020_v32  ;;  %v2100_v8 = vor.u32 %v2429_v5, %v2097_v7  ;;  %v2325_v9 = vld [vmem:[#allocation7 + $0x4] sm:$0xf]  ;;  %v1681_v10 = vld [vmem:[#allocation7 + $0x10] sm:$0xf0]  ;;  %v108_v22 = vpack.c.bf16 %v101_v13, %v100_v12  ;;  %v1927_v60 = vld [vmem:[#allocation7 + $0x1e8] sm:$0xf] }
  0x4d   :  { %1142 = vmatpush.bf16.msra.mxu3 %v2148_v34  ;;  %v2357_v11 = vld [vmem:[#allocation7 + $0x104] sm:$0xf]  ;;  %v1684_v14 = vor.u32 %v2325_v9, %v1681_v10  ;;  %v1809_v15 = vld [vmem:[#allocation7 + $0x110] sm:$0xf0]  ;;  %v109_v34 = vpack.c.bf16 %v103_v27, %v102_v26  ;;  %v2388_v61 = vld [vmem:[#allocation7 + $0x1f4] sm:$0xf0] }
  0x4e   :  { %1104 = vmatpush.bf16.msra.mxu0 %v1748_v33  ;;  %v1812_v16 = vor.u32 %v2357_v11, %v1809_v15  ;;  %v2393_v17 = vld [vmem:[#allocation7 + $0x224] sm:$0xf]  ;;  %v1953_v18 = vld [vmem:[#allocation7 + $0x230] sm:$0xf0]  ;;  %v218_v32 = vunpack.c.l.b16 %v108_v22  ;;  %v219_v33 = vunpack.c.h.b16 %v108_v22  ;;  %v1783_v9 = vld [vmem:[#allocation7 + $0xc8] sm:$0xf] }
  0x4f   :  { %1117 = vmatpush.bf16.msra.mxu1 %v1876_v35  ;;  %v2425_v19 = vld [vmem:[#allocation7 + $0x324] sm:$0xf]  ;;  %v1956_v20 = vor.u32 %v2393_v17, %v1953_v18  ;;  %v2081_v21 = vld [vmem:[#allocation7 + $0x330] sm:$0xf0]  ;;  %v220_v37 = vunpack.c.l.b16 %v109_v34  ;;  %v221_v38 = vunpack.c.h.b16 %v109_v34  ;;  %v2352_v10 = vld [vmem:[#allocation7 + $0xd4] sm:$0xf0] }
  0x50   :  { %1130 = vmatpush.bf16.msra.mxu2 %v2004_v45  ;;  %v2084_v23 = vor.u32 %v2425_v19, %v2081_v21  ;;  %v2389_v24 = vld [vmem:[#allocation7 + $0x204] sm:$0xf]  ;;  %v1937_v25 = vld [vmem:[#allocation7 + $0x210] sm:$0xf0]  ;;  %v222_v35 = vpack.c.b16 %v218_v32, %v218_v32  ;;  %v223_v36 = vpack.c.b16 %v219_v33, %v219_v33  ;;  %v1911_v13 = vld [vmem:[#allocation7 + $0x1c8] sm:$0xf]  ;;  %v1784_v17 = vor.u32 %v2352_v10, %v1783_v9 }
  0x51   :  { %1143 = vmatpush.bf16.msra.mxu3 %v2132_v47  ;;  %v1940_v28 = vor.u32 %v2389_v24, %v1937_v25  ;;  %v2421_v29 = vld [vmem:[#allocation7 + $0x304] sm:$0xf]  ;;  %v2065_v30 = vld [vmem:[#allocation7 + $0x310] sm:$0xf0]  ;;  %v225_v42 = vpack.c.b16 %v221_v38, %v221_v38  ;;  %v2055_v18 = vld [vmem:[#allocation7 + $0x2e8] sm:$0xf] }
  0x52   :  { %1105 = vmatpush.bf16.msra.mxu0 %v1732_v40  ;;  %v2068_v31 = vor.u32 %v2421_v29, %v2065_v30  ;;  %v227_v39 = vpack.i.b16 %v222_v35, %v222_v35  ;;  %v231_v40 = vpack.i.b16 %v223_v36, %v223_v36  ;;  %v2420_v19 = vld [vmem:[#allocation7 + $0x2f4] sm:$0xf0]  ;;  %v1767_v25 = vld [vmem:[#allocation7 + $0xa8] sm:$0xf] }
  0x53   :  { %1118 = vmatpush.bf16.msra.mxu1 %v1860_v41  ;;  %v224_v41 = vpack.c.b16 %v220_v37, %v220_v37  ;;  %v239_v48 = vpack.i.b16 %v225_v42, %v225_v42  ;;  %v2452_v24 = vld [vmem:[#allocation7 + $0x3f4] sm:$0xf0]  ;;  %v1895_v27 = vld [vmem:[#allocation7 + $0x1a8] sm:$0xf]  ;;  %v2056_v33 = vor.u32 %v2420_v19, %v2055_v18 }
  0x54   :  { %1131 = vmatpush.bf16.msra.mxu2 %v1988_v56  ;;  %v229_v43 = vperm.slane %v227_v39, 0  ;;  %v233_v44 = vperm.slane %v231_v40, 0  ;;  %v1799_v56 = vld [vmem:[#allocation7 + $0xe8] sm:$0xf]  ;;  %v2348_v26 = vld [vmem:[#allocation7 + $0xb4] sm:$0xf0] }
  0x55   :  { %1144 = vmatpush.bf16.msra.mxu3 %v2116_v59  ;;  %v235_v46 = vpack.i.b16 %v224_v41, %v224_v41  ;;  %v241_v55 = vperm.slane %v239_v48, 0  ;;  %v2356_v59 = vld [vmem:[#allocation7 + $0xf4] sm:$0xf0]  ;;  %v1768_v35 = vor.u32 %v2348_v26, %v1767_v25  ;;  %v2039_v36 = vld [vmem:[#allocation7 + $0x2c8] sm:$0xf] }
  0x56   :  { %1106 = vmatpush.bf16.msra.mxu0 %v1716_v51  ;;  %v246_v50 = vunpack.c.l.bf16 %v229_v43  ;;  %v247_v51 = vunpack.c.l.bf16 %v233_v44  ;;  %v1800_v7 = vor.u32 %v2356_v59, %v1799_v56  ;;  %v2416_v37 = vld [vmem:[#allocation7 + $0x2d4] sm:$0xf0]  ;;  %v2167_v41 = vld [vmem:[#allocation7 + $0x3c8] sm:$0xf] }
  0x57   :  { %1119 = vmatpush.bf16.msra.mxu1 %v1844_v53  ;;  %v237_v54 = vperm.slane %v235_v46, 0  ;;  %v249_v5 = vunpack.c.l.bf16 %v241_v55  ;;  %v2448_v42 = vld [vmem:[#allocation7 + $0x3d4] sm:$0xf0]  ;;  %v1751_v43 = vld [vmem:[#allocation7 + $0x88] sm:$0xf] }
  0x58   :  { %1132 = vmatpush.bf16.msra.mxu2 %v1972_v6  ;;  %v2344_v44 = vld [vmem:[#allocation7 + $0x94] sm:$0xf0]  ;;  %v2168_v48 = vor.u32 %v2448_v42, %v2167_v41  ;;  %v1735_v55 = vld [vmem:[#allocation7 + $0x68] sm:$0xf] }
  0x59   :  { %1145 = vmatpush.bf16.msra.mxu3 %v2100_v8  ;;  %v1928_v8 = vor.u32 %v2388_v61, %v1927_v60  ;;  %v2376_v46 = vld [vmem:[#allocation7 + $0x194] sm:$0xf0]  ;;  %v2007_v61 = vld [vmem:[#allocation7 + $0x288] sm:$0xf] }
  0x5a   :  { %1107 = vmatpush.bf16.msra.mxu0 %v1700_v0  ;;  %v2340_v56 = vld [vmem:[#allocation7 + $0x74] sm:$0xf0]  ;;  %v1991_v9 = vld [vmem:[#allocation7 + $0x268] sm:$0xf] }
  0x5b   :  { %1120 = vmatpush.bf16.msra.mxu1 %v1828_v2  ;;  %v248_v2 = vunpack.c.l.bf16 %v237_v54  ;;  %v2444_v54 = vld [vmem:[#allocation7 + $0x3b4] sm:$0xf0]  ;;  %v1831_v19 = vld [vmem:[#allocation7 + $0x128] sm:$0xf] }
  0x5c   :  { %1133 = vmatpush.bf16.msra.mxu2 %v1956_v20  ;;  %v2183_v20 = vld [vmem:[#allocation7 + $0x3e8] sm:$0xf]  ;;  %v2404_v10 = vld [vmem:[#allocation7 + $0x274] sm:$0xf0] }
  0x5d   :  { %1146 = vmatpush.bf16.msra.mxu3 %v2084_v23  ;;  %v2184_v34 = vor.u32 %v2452_v24, %v2183_v20  ;;  %v2332_v18 = vld [vmem:[#allocation7 + $0x34] sm:$0xf0]  ;;  %v2103_v25 = vld [vmem:[#allocation7 + $0x348] sm:$0xf] }
  0x5e   :  { %1108 = vmatpush.bf16.msra.mxu0 %v1684_v14  ;;  %v2384_v14 = vld [vmem:[#allocation7 + $0x1d4] sm:$0xf0]  ;;  %v1959_v41 = vld [vmem:[#allocation7 + $0x228] sm:$0xf] }
  0x5f   :  { %1121 = vmatpush.bf16.msra.mxu1 %v1812_v16  ;;  %v1912_v23 = vor.u32 %v2384_v14, %v1911_v13  ;;  %v2119_v13 = vld [vmem:[#allocation7 + $0x368] sm:$0xf]  ;;  %v2436_v14 = vld [vmem:[#allocation7 + $0x374] sm:$0xf0] }
  0x60   :  { %1134 = vmatpush.bf16.msra.mxu2 %v1940_v28  ;;  %v2380_v28 = vld [vmem:[#allocation7 + $0x1b4] sm:$0xf0] }
  0x61   :  { %1147 = vmatpush.bf16.msra.mxu3 %v2068_v31  ;;  %v1896_v40 = vor.u32 %v2380_v28, %v1895_v27  ;;  %v2364_v20 = vld [vmem:[#allocation7 + $0x134] sm:$0xf0] }
  0x62   :  { %v2400_v24 = vld [vmem:[#allocation7 + $0x254] sm:$0xf0]  ;;  %v1832_v28 = vor.u32 %v2364_v20, %v1831_v19  ;;  %v2374_v19 = vld [vmem:[#allocation7 + $0x18c] sm:$0xf]  ;;  %v1881_v20 = vld [vmem:[#allocation7 + $0x198] sm:$0xf0] }
  0x63   :  { %v2432_v26 = vld [vmem:[#allocation7 + $0x354] sm:$0xf0] }
  0x64   :  { %v2396_v42 = vld [vmem:[#allocation7 + $0x234] sm:$0xf0] }
  0x9e   :  { %v171_v45 = vpop.f32.mrf.mxu0 }
  0x9f   :  { %v184_v47 = vpop.f32.mrf.mxu1 }
  0xa0   :  { %v214_v49 = vpack.c.bf16 %v184_v47, %v171_v45  ;;  %v1879_v45 = vld [vmem:[#allocation7 + $0x188] sm:$0xf]  ;;  %v2040_v47 = vor.u32 %v2416_v37, %v2039_v36  ;;  %v2104_v36 = vor.u32 %v2432_v26, %v2103_v25  ;;  %v2386_v37 = vld [vmem:[#allocation7 + $0x1ec] sm:$0xf]  ;;  %v2153_v26 = vld [vmem:[#allocation7 + $0x3b8] sm:$0xf0] }
  0xa1   :  { %v2442_v25 = vld [vmem:[#allocation7 + $0x3ac] sm:$0xf] }
  0xa2   :  { %v242_v52 = vunpack.c.l.bf16 %v214_v49  ;;  %v243_v53 = vunpack.c.h.bf16 %v214_v49  ;;  %v2023_v49 = vld [vmem:[#allocation7 + $0x2a8] sm:$0xf] }
  0xa4   :  { %v250_v57 = vadd.f32 %v246_v50, %v242_v52  ;;  %v251_v58 = vadd.f32 %v247_v51, %v243_v53  ;;  %v1752_v50 = vor.u32 %v2344_v44, %v1751_v43  ;;  %v1880_v51 = vor.u32 %v2376_v46, %v1879_v45  ;;  %v2412_v52 = vld [vmem:[#allocation7 + $0x2b4] sm:$0xf0]  ;;  %v2151_v53 = vld [vmem:[#allocation7 + $0x3a8] sm:$0xf] }
  0xa5   :  { %v2024_v59 = vor.u32 %v2412_v52, %v2023_v49  ;;  %v2152_v60 = vor.u32 %v2444_v54, %v2151_v53  ;;  %v2087_v43 = vld [vmem:[#allocation7 + $0x328] sm:$0xf]  ;;  %v2428_v44 = vld [vmem:[#allocation7 + $0x334] sm:$0xf0]  ;;  %v2350_v49 = vld [vmem:[#allocation7 + $0xcc] sm:$0xf]  ;;  %v1960_v52 = vor.u32 %v2396_v42, %v1959_v41 }
  0xa6   :  { %v197_v62 = vpop.f32.mrf.mxu2  ;;  %v260_v63 = vmax.f32 %v250_v57, 0.0  ;;  %v261_v0 = vmax.f32 %v251_v58, 0.0  ;;  %v173_v3 = vpop.f32.mrf.mxu0  ;;  %v1863_v57 = vld [vmem:[#allocation7 + $0x168] sm:$0xf]  ;;  %v2372_v58 = vld [vmem:[#allocation7 + $0x174] sm:$0xf0]  ;;  %v2088_v53 = vor.u32 %v2428_v44, %v2087_v43 }
  0xa7   :  { %v210_v1 = vpop.f32.mrf.mxu3  ;;  %v186_v6 = vpop.f32.mrf.mxu1  ;;  %v1719_v3 = vld [vmem:[#allocation7 + $0x48] sm:$0xf]  ;;  %v1913_v54 = vld [vmem:[#allocation7 + $0x1d8] sm:$0xf0]  ;;  %v2334_v43 = vld [vmem:[#allocation7 + $0x4c] sm:$0xf] }
  0xa8   :  { %v215_v4 = vpack.c.bf16 %v210_v1, %v197_v62  ;;  %v2707_v11 = vpack.c.bf16 %v260_v63, %v260_v63  ;;  %v2709_v12 = vpack.c.bf16 %v261_v0, %v261_v0  ;;  %v2408_v62 = vld [vmem:[#allocation7 + $0x294] sm:$0xf0]  ;;  %v2135_v63 = vld [vmem:[#allocation7 + $0x388] sm:$0xf]  ;;  %v1736_v1 = vor.u32 %v2340_v56, %v1735_v55  ;;  %v1721_v44 = vld [vmem:[#allocation7 + $0x58] sm:$0xf0] }
  0xa9   :  { %v2440_v0 = vld [vmem:[#allocation7 + $0x394] sm:$0xf0]  ;;  %v1943_v55 = vld [vmem:[#allocation7 + $0x208] sm:$0xf] }
  0xaa   :  { %v244_v15 = vunpack.c.l.bf16 %v215_v4  ;;  %v245_v16 = vunpack.c.h.bf16 %v215_v4  ;;  %1057 = vmatmul.bf16.vlgmr.msrb.gmra.mxu0 %v2707_v11  ;;  %1070 = vmatmul.bf16.vlgmr.msrb.gmra.mxu1 %v2709_v12  ;;  %v2336_v4 = vld [vmem:[#allocation7 + $0x54] sm:$0xf0] }
  0xab   :  { %1153 = vmatpush.bf16.msrb.mxu0 %v1800_v7  ;;  %1166 = vmatpush.bf16.msrb.mxu1 %v1928_v8  ;;  %v2368_v6 = vld [vmem:[#allocation7 + $0x154] sm:$0xf0]  ;;  %v2008_v7 = vor.u32 %v2408_v62, %v2007_v61  ;;  %v2136_v8 = vor.u32 %v2440_v0, %v2135_v63  ;;  %v2450_v61 = vld [vmem:[#allocation7 + $0x3ec] sm:$0xf]  ;;  %v2185_v62 = vld [vmem:[#allocation7 + $0x3f8] sm:$0xf0] }
  0xac   :  { %v252_v21 = vadd.f32 %v248_v2, %v244_v15  ;;  %v253_v22 = vadd.f32 %v249_v5, %v245_v16  ;;  %v1864_v2 = vor.u32 %v2372_v58, %v1863_v57  ;;  %v1847_v5 = vld [vmem:[#allocation7 + $0x148] sm:$0xf]  ;;  %v1720_v15 = vor.u32 %v2336_v4, %v1719_v3  ;;  %v2392_v56 = vld [vmem:[#allocation7 + $0x214] sm:$0xf0]  ;;  %v1769_v4 = vld [vmem:[#allocation7 + $0xb8] sm:$0xf0] }
  0xad   :  { %v1848_v16 = vor.u32 %v2368_v6, %v1847_v5  ;;  %v2071_v57 = vld [vmem:[#allocation7 + $0x308] sm:$0xf]  ;;  %v2424_v58 = vld [vmem:[#allocation7 + $0x314] sm:$0xf0]  ;;  %v2378_v5 = vld [vmem:[#allocation7 + $0x1ac] sm:$0xf] }
  0xae   :  { %v262_v29 = vmax.f32 %v252_v21, 0.0  ;;  %v263_v30 = vmax.f32 %v253_v22, 0.0  ;;  %v199_v31 = vpop.f32.mrf.mxu2  ;;  %v1992_v21 = vor.u32 %v2404_v10, %v1991_v9  ;;  %v2120_v22 = vor.u32 %v2436_v14, %v2119_v13  ;;  %v1897_v6 = vld [vmem:[#allocation7 + $0x1b8] sm:$0xf0]  ;;  %v2414_v9 = vld [vmem:[#allocation7 + $0x2cc] sm:$0xf] }
  0xaf   :  { %v212_v32 = vpop.f32.mrf.mxu3  ;;  %1154 = vmatpush.bf16.msrb.mxu0 %v1784_v17  ;;  %1167 = vmatpush.bf16.msrb.mxu1 %v1912_v23  ;;  %v1703_v17 = vld [vmem:[#allocation7 + $0x28] sm:$0xf]  ;;  %v2072_v3 = vor.u32 %v2424_v58, %v2071_v57  ;;  %v2041_v10 = vld [vmem:[#allocation7 + $0x2d8] sm:$0xf0]  ;;  %v2446_v13 = vld [vmem:[#allocation7 + $0x3cc] sm:$0xf] }
  0xb0   :  { %v2713_v38 = vpack.c.bf16 %v262_v29, %v262_v29  ;;  %v2715_v39 = vpack.c.bf16 %v263_v30, %v263_v30  ;;  %v1975_v23 = vld [vmem:[#allocation7 + $0x248] sm:$0xf]  ;;  %v1704_v27 = vor.u32 %v2332_v18, %v1703_v17  ;;  %v2328_v30 = vld [vmem:[#allocation7 + $0x14] sm:$0xf0]  ;;  %v2169_v14 = vld [vmem:[#allocation7 + $0x3d8] sm:$0xf0] }
  0xb1   :  { %v1687_v29 = vld [vmem:[#allocation7 + $0x8] sm:$0xf]  ;;  %v2360_v32 = vld [vmem:[#allocation7 + $0x114] sm:$0xf0]  ;;  %v2342_v17 = vld [vmem:[#allocation7 + $0x8c] sm:$0xf] }
  0xb2   :  { %1083 = vmatmul.bf16.vlgmr.msrb.gmra.mxu2 %v2713_v38  ;;  %1096 = vmatmul.bf16.vlgmr.msrb.gmra.mxu3 %v2715_v39  ;;  %v1815_v31 = vld [vmem:[#allocation7 + $0x108] sm:$0xf]  ;;  %v1688_v45 = vor.u32 %v2328_v30, %v1687_v29  ;;  %v1753_v18 = vld [vmem:[#allocation7 + $0x98] sm:$0xf0]  ;;  %v2338_v29 = vld [vmem:[#allocation7 + $0x6c] sm:$0xf] }
  0xb3   :  { %1179 = vmatpush.bf16.msrb.mxu2 %v2056_v33  ;;  %1192 = vmatpush.bf16.msrb.mxu3 %v2184_v34  ;;  %v2354_v33 = vld [vmem:[#allocation7 + $0xec] sm:$0xf]  ;;  %v1801_v34 = vld [vmem:[#allocation7 + $0xf8] sm:$0xf0]  ;;  %v1816_v46 = vor.u32 %v2360_v32, %v1815_v31 }
  0xb4   :  { %1155 = vmatpush.bf16.msrb.mxu0 %v1768_v35  ;;  %1168 = vmatpush.bf16.msrb.mxu1 %v1896_v40  ;;  %v1976_v35 = vor.u32 %v2400_v24, %v1975_v23  ;;  %v1929_v40 = vld [vmem:[#allocation7 + $0x1f8] sm:$0xf0]  ;;  %v2410_v23 = vld [vmem:[#allocation7 + $0x2ac] sm:$0xf] }
  0xb5   :  { %v2025_v24 = vld [vmem:[#allocation7 + $0x2b8] sm:$0xf0]  ;;  %v2370_v31 = vld [vmem:[#allocation7 + $0x16c] sm:$0xf] }
  0xb6   :  { %v1737_v30 = vld [vmem:[#allocation7 + $0x78] sm:$0xf0]  ;;  %v2362_v57 = vld [vmem:[#allocation7 + $0x12c] sm:$0xf] }
  0xb7   :  { %1180 = vmatpush.bf16.msrb.mxu2 %v2040_v47  ;;  %1193 = vmatpush.bf16.msrb.mxu3 %v2168_v48  ;;  %v1804_v47 = vor.u32 %v2354_v33, %v1801_v34  ;;  %v1932_v48 = vor.u32 %v2386_v37, %v1929_v40  ;;  %v1865_v32 = vld [vmem:[#allocation7 + $0x178] sm:$0xf0]  ;;  %v2028_v33 = vor.u32 %v2410_v23, %v2025_v24  ;;  %v2438_v37 = vld [vmem:[#allocation7 + $0x38c] sm:$0xf] }
  0xb8   :  { %1156 = vmatpush.bf16.msrb.mxu0 %v1752_v50  ;;  %1169 = vmatpush.bf16.msrb.mxu1 %v1880_v51  ;;  %v1785_v50 = vld [vmem:[#allocation7 + $0xd8] sm:$0xf0]  ;;  %v2382_v51 = vld [vmem:[#allocation7 + $0x1cc] sm:$0xf]  ;;  %v2156_v34 = vor.u32 %v2442_v25, %v2153_v26  ;;  %v1740_v41 = vor.u32 %v2338_v29, %v1737_v30  ;;  %v1868_v42 = vor.u32 %v2370_v31, %v1865_v32 }
  0xb9   :  { %v1788_v63 = vor.u32 %v2350_v49, %v1785_v50  ;;  %v1916_v0 = vor.u32 %v2382_v51, %v1913_v54  ;;  %v2137_v40 = vld [vmem:[#allocation7 + $0x398] sm:$0xf0]  ;;  %v2402_v49 = vld [vmem:[#allocation7 + $0x26c] sm:$0xf] }
  0xba   :  { %1109 = vmatmul.bf16.vlgmr.msra.gmra.mxu0 %v2707_v11  ;;  %1122 = vmatmul.bf16.vlgmr.msra.gmra.mxu1 %v2709_v12  ;;  %v1993_v50 = vld [vmem:[#allocation7 + $0x278] sm:$0xf0]  ;;  %v2434_v51 = vld [vmem:[#allocation7 + $0x36c] sm:$0xf] }
  0xbb   :  { %1181 = vmatpush.bf16.msrb.mxu2 %v2024_v59  ;;  %1194 = vmatpush.bf16.msrb.mxu3 %v2152_v60  ;;  %v2418_v59 = vld [vmem:[#allocation7 + $0x2ec] sm:$0xf]  ;;  %v2057_v60 = vld [vmem:[#allocation7 + $0x2f8] sm:$0xf0] }
  0xbc   :  { %1157 = vmatpush.bf16.msrb.mxu0 %v1736_v1  ;;  %1170 = vmatpush.bf16.msrb.mxu1 %v1864_v2  ;;  %v2346_v1 = vld [vmem:[#allocation7 + $0xac] sm:$0xf]  ;;  %v1944_v2 = vor.u32 %v2392_v56, %v1943_v55  ;;  %v1705_v56 = vld [vmem:[#allocation7 + $0x38] sm:$0xf0] }
  0xbd   :  { %v2330_v55 = vld [vmem:[#allocation7 + $0x2c] sm:$0xf]  ;;  %v1833_v58 = vld [vmem:[#allocation7 + $0x138] sm:$0xf0] }
  0xbe   :  { %v2460_v25 = vld [vmem:[#allocation8 + $0x38] sm:$0xff]  ;;  %v2458_v29 = vld [vmem:[#allocation8 + $0x28] sm:$0xff] }
  0xbf   :  { %1182 = vmatpush.bf16.msrb.mxu2 %v2008_v7  ;;  %1195 = vmatpush.bf16.msrb.mxu3 %v2136_v8  ;;  %v2060_v7 = vor.u32 %v2418_v59, %v2057_v60  ;;  %v2188_v8 = vor.u32 %v2450_v61, %v2185_v62  ;;  %v1996_v59 = vor.u32 %v2402_v49, %v1993_v50  ;;  %v2398_v61 = vld [vmem:[#allocation7 + $0x24c] sm:$0xf]  ;;  %v1977_v62 = vld [vmem:[#allocation7 + $0x258] sm:$0xf0] }
  0xc0   :  { %1158 = vmatpush.bf16.msrb.mxu0 %v1720_v15  ;;  %1171 = vmatpush.bf16.msrb.mxu1 %v1848_v16  ;;  %v1772_v15 = vor.u32 %v2346_v1, %v1769_v4  ;;  %v1900_v16 = vor.u32 %v2378_v5, %v1897_v6  ;;  %v1708_v1 = vor.u32 %v2330_v55, %v1705_v56  ;;  %v1689_v4 = vld [vmem:[#allocation7 + $0x18] sm:$0xf0]  ;;  %v2358_v5 = vld [vmem:[#allocation7 + $0x10c] sm:$0xf] }
  0xc1   :  { %v1817_v6 = vld [vmem:[#allocation7 + $0x118] sm:$0xf0]  ;;  %v2466_v30 = vld [vmem:[#allocation8 + $0x68] sm:$0xff] }
  0xc2   :  { %1135 = vmatmul.bf16.vlgmr.msra.gmra.mxu2 %v2713_v38  ;;  %1148 = vmatmul.bf16.vlgmr.msra.gmra.mxu3 %v2715_v39  ;;  %v2468_v26 = vld [vmem:[#allocation8 + $0x78] sm:$0xff] }
  0xc3   :  { %1183 = vmatpush.bf16.msrb.mxu2 %v1992_v21  ;;  %1196 = vmatpush.bf16.msrb.mxu3 %v2120_v22  ;;  %v2044_v21 = vor.u32 %v2414_v9, %v2041_v10  ;;  %v2172_v22 = vor.u32 %v2446_v13, %v2169_v14  ;;  %v2394_v9 = vld [vmem:[#allocation7 + $0x22c] sm:$0xf]  ;;  %v1961_v10 = vld [vmem:[#allocation7 + $0x238] sm:$0xf0] }
  0xc4   :  { %1159 = vmatpush.bf16.msrb.mxu0 %v1704_v27  ;;  %1172 = vmatpush.bf16.msrb.mxu1 %v1832_v28  ;;  %v1756_v27 = vor.u32 %v2342_v17, %v1753_v18  ;;  %v1884_v28 = vor.u32 %v2374_v19, %v1881_v20  ;;  %v2426_v13 = vld [vmem:[#allocation7 + $0x32c] sm:$0xf]  ;;  %v2089_v14 = vld [vmem:[#allocation7 + $0x338] sm:$0xf0]  ;;  %v1964_v17 = vor.u32 %v2394_v9, %v1961_v10 }
  0xc5   :  { %v2092_v18 = vor.u32 %v2426_v13, %v2089_v14  ;;  %v2390_v19 = vld [vmem:[#allocation7 + $0x20c] sm:$0xf]  ;;  %v1945_v20 = vld [vmem:[#allocation7 + $0x218] sm:$0xf0] }
  0xc6   :  { %v1948_v23 = vor.u32 %v2390_v19, %v1945_v20  ;;  %v2456_v31 = vld [vmem:[#allocation8 + $0x18] sm:$0xff]  ;;  %v2474_v9 = vld [vmem:[#allocation8 + $0xa8] sm:$0xff] }
  0xc7   :  { %1184 = vmatpush.bf16.msrb.mxu2 %v1976_v35  ;;  %1197 = vmatpush.bf16.msrb.mxu3 %v2104_v36  ;;  %v2406_v35 = vld [vmem:[#allocation7 + $0x28c] sm:$0xf]  ;;  %v2009_v36 = vld [vmem:[#allocation7 + $0x298] sm:$0xf0] }
  0xc8   :  { %1160 = vmatpush.bf16.msrb.mxu0 %v1688_v45  ;;  %1173 = vmatpush.bf16.msrb.mxu1 %v1816_v46  ;;  %v2366_v45 = vld [vmem:[#allocation7 + $0x14c] sm:$0xf]  ;;  %v1849_v46 = vld [vmem:[#allocation7 + $0x158] sm:$0xf0] }
  0xc9   :  { %v1852_v54 = vor.u32 %v2366_v45, %v1849_v46  ;;  %v2482_v10 = vld [vmem:[#allocation8 + $0xe8] sm:$0xff] }
  0xcb   :  { %1185 = vmatpush.bf16.msrb.mxu2 %v1960_v52  ;;  %1198 = vmatpush.bf16.msrb.mxu3 %v2088_v53  ;;  %v2121_v52 = vld [vmem:[#allocation7 + $0x378] sm:$0xf0]  ;;  %v1724_v53 = vor.u32 %v2334_v43, %v1721_v44  ;;  %v2461_v43 = vld [vmem:[#allocation8 + $0x40] sm:$0xff] }
  0xcc   :  { %1205 = vmatpush.bf16.msra.mxu0 %v1804_v47  ;;  %1218 = vmatpush.bf16.msra.mxu1 %v1932_v48  ;;  %v2012_v47 = vor.u32 %v2406_v35, %v2009_v36  ;;  %v2140_v48 = vor.u32 %v2438_v37, %v2137_v40  ;;  %v2124_v60 = vor.u32 %v2434_v51, %v2121_v52  ;;  %v2454_v35 = vld [vmem:[#allocation8 + $0x8] sm:$0xff] }
  0xcd   :  { %1161 = vmatmul.bf16.vlgmr.msrb.gmra.mxu0 %v2707_v11  ;;  %1174 = vmatmul.bf16.vlgmr.msrb.gmra.mxu1 %v2709_v12  ;;  %v2462_v36 = vld [vmem:[#allocation8 + $0x48] sm:$0xff] }
  0xce   :  { %v2731_v37 = vld [vmem:[#allocation10 + $0x1] ss:$4 sm:$0xf] }
  0xcf   :  { %1186 = vmatpush.bf16.msrb.mxu2 %v1944_v2  ;;  %1199 = vmatpush.bf16.msrb.mxu3 %v2072_v3  ;;  %v1836_v2 = vor.u32 %v2362_v57, %v1833_v58  ;;  %v2326_v3 = vld [vmem:[#allocation7 + $0xc] sm:$0xf]  ;;  %v271_v44 = vperm.slane %v2731_v37, 0  ;;  %v272_v45 = vperm.slane %v2731_v37, 1  ;;  %v2476_v57 = vld [vmem:[#allocation8 + $0xb8] sm:$0xff] }
  0xd0   :  { %1206 = vmatpush.bf16.msra.mxu0 %v1788_v63  ;;  %1219 = vmatpush.bf16.msra.mxu1 %v1916_v0  ;;  %v2430_v63 = vld [vmem:[#allocation7 + $0x34c] sm:$0xf]  ;;  %v2105_v0 = vld [vmem:[#allocation7 + $0x358] sm:$0xf0] }
  0xd1   :  { %v2484_v58 = vld [vmem:[#allocation8 + $0xf8] sm:$0xff] }
  0xd2   :  { %1187 = vmatmul.bf16.vlgmr.msrb.gmra.mxu2 %v2713_v38  ;;  %1200 = vmatmul.bf16.vlgmr.msrb.gmra.mxu3 %v2715_v39 }
  0xd3   :  { %1231 = vmatpush.bf16.msra.mxu2 %v2060_v7  ;;  %1244 = vmatpush.bf16.msra.mxu3 %v2188_v8  ;;  %v1980_v7 = vor.u32 %v2398_v61, %v1977_v62  ;;  %v2108_v8 = vor.u32 %v2430_v63, %v2105_v0 }
  0xd4   :  { %1207 = vmatpush.bf16.msra.mxu0 %v1772_v15  ;;  %1220 = vmatpush.bf16.msra.mxu1 %v1900_v16  ;;  %v1692_v15 = vor.u32 %v2326_v3, %v1689_v4  ;;  %v1820_v16 = vor.u32 %v2358_v5, %v1817_v6  ;;  %v2483_v3 = vld [vmem:[#allocation8 + $0xf0] sm:$0xff] }
  0xd7   :  { %1232 = vmatpush.bf16.msra.mxu2 %v2044_v21  ;;  %1245 = vmatpush.bf16.msra.mxu3 %v2172_v22  ;;  %v2422_v21 = vld [vmem:[#allocation7 + $0x30c] sm:$0xf]  ;;  %v2073_v22 = vld [vmem:[#allocation7 + $0x318] sm:$0xf0] }
  0xd8   :  { %1208 = vmatpush.bf16.msra.mxu0 %v1756_v27  ;;  %1221 = vmatpush.bf16.msra.mxu1 %v1884_v28  ;;  %v2076_v24 = vor.u32 %v2422_v21, %v2073_v22  ;;  %v2459_v27 = vld [vmem:[#allocation8 + $0x30] sm:$0xff]  ;;  %v2473_v22 = vld [vmem:[#allocation8 + $0xa0] sm:$0xff] }
  0xd9   :  { %v2467_v28 = vld [vmem:[#allocation8 + $0x70] sm:$0xff] }
  0xdb   :  { %1233 = vmatpush.bf16.msra.mxu2 %v2028_v33  ;;  %1246 = vmatpush.bf16.msra.mxu3 %v2156_v34  ;;  %v2455_v33 = vld [vmem:[#allocation8 + $0x10] sm:$0xff] }
  0xdc   :  { %1209 = vmatpush.bf16.msra.mxu0 %v1740_v41  ;;  %1222 = vmatpush.bf16.msra.mxu1 %v1868_v42  ;;  %v2463_v34 = vld [vmem:[#allocation8 + $0x50] sm:$0xff]  ;;  %v2453_v42 = vld [vmem:[#allocation8] sm:$0xff] }
  0xdf   :  { %1234 = vmatpush.bf16.msra.mxu2 %v2012_v47  ;;  %1247 = vmatpush.bf16.msra.mxu3 %v2140_v48  ;;  %v279_v48 = vpack.c.bf16 %v272_v45, %v271_v44  ;;  %v273_v45 = vperm.slane %v2731_v37, 2 }
  0xe0   :  { %1210 = vmatpush.bf16.msra.mxu0 %v1724_v53  ;;  %1223 = vmatpush.bf16.msra.mxu1 %v1852_v54 }
  0xe1   :  { %v1261_v51 = vunpack.c.l.b16 %v279_v48  ;;  %v1262_v52 = vunpack.c.h.b16 %v279_v48 }
  0xe3   :  { %1235 = vmatpush.bf16.msra.mxu2 %v1996_v59  ;;  %1248 = vmatpush.bf16.msra.mxu3 %v2124_v60  ;;  %v1265_v55 = vpack.c.b16 %v1261_v51, %v1261_v51  ;;  %v1266_v56 = vpack.c.b16 %v1262_v52, %v1262_v52 }
  0xe4   :  { %1211 = vmatpush.bf16.msra.mxu0 %v1708_v1  ;;  %1224 = vmatpush.bf16.msra.mxu1 %v1836_v2  ;;  %v2475_v2 = vld [vmem:[#allocation8 + $0xb0] sm:$0xff] }
  0xe5   :  { %v1270_v62 = vpack.i.b16 %v1265_v55, %v1265_v55  ;;  %v1274_v63 = vpack.i.b16 %v1266_v56, %v1266_v56 }
  0xe7   :  { %1236 = vmatpush.bf16.msra.mxu2 %v1980_v7  ;;  %1249 = vmatpush.bf16.msra.mxu3 %v2108_v8  ;;  %v1272_v7 = vperm.slane %v1270_v62, 0  ;;  %v1276_v8 = vperm.slane %v1274_v63, 0 }
  0xe8   :  { %1212 = vmatpush.bf16.msra.mxu0 %v1692_v15  ;;  %1225 = vmatpush.bf16.msra.mxu1 %v1820_v16 }
  0xe9   :  { %v1290_v19 = vunpack.c.l.bf16 %v1276_v8 }
  0xeb   :  { %1237 = vmatpush.bf16.msra.mxu2 %v1964_v17  ;;  %1250 = vmatpush.bf16.msra.mxu3 %v2092_v18  ;;  %v1289_v18 = vunpack.c.l.bf16 %v1272_v7 }
  0xec   :  { %1213 = vmatmul.bf16.vlgmr.msra.gmra.mxu0 %v2707_v11  ;;  %1226 = vmatmul.bf16.vlgmr.msra.gmra.mxu1 %v2709_v12  ;;  %v2457_v11 = vld [vmem:[#allocation8 + $0x20] sm:$0xff] }
  0xed   :  { %1569 = vmatpush.bf16.msrb.mxu0 %v2460_v25  ;;  %1582 = vmatpush.bf16.msrb.mxu1 %v2468_v26  ;;  %v2465_v12 = vld [vmem:[#allocation8 + $0x60] sm:$0xff] }
  0xef   :  { %1238 = vmatpush.bf16.msra.mxu2 %v1948_v23  ;;  %1251 = vmatpush.bf16.msra.mxu3 %v2076_v24  ;;  %v2481_v23 = vld [vmem:[#allocation8 + $0xe0] sm:$0xff] }
  0xf1   :  { %1570 = vmatpush.bf16.msrb.mxu0 %v2459_v27  ;;  %1583 = vmatpush.bf16.msrb.mxu1 %v2467_v28 }
  0xf2   :  { %1239 = vmatmul.bf16.vlgmr.msra.gmra.mxu2 %v2713_v38  ;;  %1252 = vmatmul.bf16.vlgmr.msra.gmra.mxu3 %v2715_v39  ;;  %v2464_v38 = vld [vmem:[#allocation8 + $0x58] sm:$0xff] }
  0xf3   :  { %1595 = vmatpush.bf16.msrb.mxu2 %v2476_v57  ;;  %1608 = vmatpush.bf16.msrb.mxu3 %v2484_v58 }
  0xf5   :  { %1571 = vmatpush.bf16.msrb.mxu0 %v2458_v29  ;;  %1584 = vmatpush.bf16.msrb.mxu1 %v2466_v30  ;;  %v2472_v30 = vld [vmem:[#allocation8 + $0x98] sm:$0xff] }
  0xf7   :  { %1596 = vmatpush.bf16.msrb.mxu2 %v2475_v2  ;;  %1609 = vmatpush.bf16.msrb.mxu3 %v2483_v3 }
  0xf9   :  { %1572 = vmatpush.bf16.msrb.mxu0 %v2457_v11  ;;  %1585 = vmatpush.bf16.msrb.mxu1 %v2465_v12  ;;  %v2480_v11 = vld [vmem:[#allocation8 + $0xd8] sm:$0xff] }
  0xfb   :  { %1597 = vmatpush.bf16.msrb.mxu2 %v2474_v9  ;;  %1610 = vmatpush.bf16.msrb.mxu3 %v2482_v10 }
  0xfd   :  { %1573 = vmatpush.bf16.msrb.mxu0 %v2456_v31  ;;  %1586 = vmatpush.bf16.msrb.mxu1 %v2464_v38 }
  0xff   :  { %1598 = vmatpush.bf16.msrb.mxu2 %v2473_v22  ;;  %1611 = vmatpush.bf16.msrb.mxu3 %v2481_v23  ;;  %v2495_v22 = vld [vmem:[#allocation10 + $0x2] ss:$0 sm:$0xff] }
 0x101   :  { %1574 = vmatpush.bf16.msrb.mxu0 %v2455_v33  ;;  %1587 = vmatpush.bf16.msrb.mxu1 %v2463_v34  ;;  %v2479_v33 = vld [vmem:[#allocation8 + $0xd0] sm:$0xff] }
 0x103   :  { %1599 = vmatpush.bf16.msrb.mxu2 %v2472_v30  ;;  %1612 = vmatpush.bf16.msrb.mxu3 %v2480_v11 }
 0x105   :  { %1575 = vmatpush.bf16.msrb.mxu0 %v2454_v35  ;;  %1588 = vmatpush.bf16.msrb.mxu1 %v2462_v36  ;;  %v2470_v36 = vld [vmem:[#allocation8 + $0x88] sm:$0xff] }
 0x107   :  { %1613 = vmatpush.bf16.msrb.mxu3 %v2479_v33 }
 0x109   :  { %1576 = vmatpush.bf16.msrb.mxu0 %v2453_v42  ;;  %1589 = vmatpush.bf16.msrb.mxu1 %v2461_v43  ;;  %v2477_v42 = vld [vmem:[#allocation8 + $0xc0] sm:$0xff] }
 0x127   :  { %v1058_v39 = vpop.f32.mrf.mxu0  ;;  %v1071_v32 = vpop.f32.mrf.mxu1 }
 0x128   :  { %v1072_v59 = vadd.f32 %v1071_v32, %v1058_v39  ;;  %v2471_v32 = vld [vmem:[#allocation8 + $0x90] sm:$0xff] }
 0x129   :  { %1600 = vmatpush.bf16.msrb.mxu2 %v2471_v32 }
 0x12d   :  { %1601 = vmatpush.bf16.msrb.mxu2 %v2470_v36 }
 0x12f   :  { %v1060_v40 = vpop.f32.mrf.mxu0  ;;  %v1073_v41 = vpop.f32.mrf.mxu1 }
 0x130   :  { %v2478_v40 = vld [vmem:[#allocation8 + $0xc8] sm:$0xff]  ;;  %v2469_v41 = vld [vmem:[#allocation8 + $0x80] sm:$0xff] }
 0x131   :  { %1614 = vmatpush.bf16.msrb.mxu3 %v2478_v40  ;;  %1602 = vmatpush.bf16.msrb.mxu2 %v2469_v41 }
 0x135   :  { %v1084_v46 = vpop.f32.mrf.mxu2  ;;  %v1097_v47 = vpop.f32.mrf.mxu3  ;;  %1615 = vmatpush.bf16.msrb.mxu3 %v2477_v42 }
 0x136   :  { %v1085_v0 = vadd.f32 %v1084_v46, %v1072_v59  ;;  %v274_v46 = vperm.slane %v2731_v37, 3 }
 0x137   :  { %v1110_v49 = vpop.f32.mrf.mxu0  ;;  %v1123_v50 = vpop.f32.mrf.mxu1 }
 0x138   :  { %v1124_v1 = vadd.f32 %v1123_v50, %v1110_v49  ;;  %v1098_v13 = vadd.f32 %v1097_v47, %v1085_v0  ;;  %v280_v47 = vpack.c.bf16 %v274_v46, %v273_v45 }
 0x13a   :  { %v1263_v50 = vunpack.c.l.b16 %v280_v47  ;;  %v1264_v51 = vunpack.c.h.b16 %v280_v47 }
 0x13c   :  { %v1267_v52 = vpack.c.b16 %v1263_v50, %v1263_v50 }
 0x13d   :  { %v1086_v53 = vpop.f32.mrf.mxu2  ;;  %v1099_v54 = vpop.f32.mrf.mxu3 }
 0x13e   :  { %v1268_v53 = vpack.c.b16 %v1264_v51, %v1264_v51  ;;  %v1278_v57 = vpack.i.b16 %v1267_v52, %v1267_v52 }
 0x13f   :  { %v1112_v60 = vpop.f32.mrf.mxu0  ;;  %v1125_v61 = vpop.f32.mrf.mxu1 }
 0x140   :  { %v1282_v58 = vpack.i.b16 %v1268_v53, %v1268_v53  ;;  %v1280_v0 = vperm.slane %v1278_v57, 0 }
 0x145   :  { %v1136_v4 = vpop.f32.mrf.mxu2  ;;  %v1149_v5 = vpop.f32.mrf.mxu3 }
 0x146   :  { %v1137_v6 = vadd.f32 %v1136_v4, %v1124_v1  ;;  %v1284_v1 = vperm.slane %v1282_v58, 0  ;;  %v1291_v4 = vunpack.c.l.bf16 %v1280_v0 }
 0x148   :  { %v1150_v14 = vadd.f32 %v1149_v5, %v1137_v6  ;;  %v1292_v5 = vunpack.c.l.bf16 %v1284_v1 }
 0x14a   :  { %v1162_v15 = vpop.f32.mrf.mxu0  ;;  %v1175_v16 = vpop.f32.mrf.mxu1  ;;  %v1257_v17 = vpack.c.bf16 %v1150_v14, %v1098_v13 }
 0x14b   :  { %v1176_v56 = vadd.f32 %v1175_v16, %v1162_v15 }
 0x14c   :  { %v1285_v20 = vunpack.c.l.bf16 %v1257_v17  ;;  %v1286_v21 = vunpack.c.h.bf16 %v1257_v17 }
 0x14d   :  { %v1138_v24 = vpop.f32.mrf.mxu2  ;;  %v1151_v25 = vpop.f32.mrf.mxu3 }
 0x14e   :  { %v1293_v26 = vadd.f32 %v1289_v18, %v1285_v20  ;;  %v1294_v27 = vadd.f32 %v1290_v19, %v1286_v21 }
 0x150   :  { %v1303_v28 = vmax.f32 %v1293_v26, 0.0  ;;  %v1304_v29 = vmax.f32 %v1294_v27, 0.0 }
 0x152   :  { %v1164_v12 = vpop.f32.mrf.mxu0  ;;  %v1177_v31 = vpop.f32.mrf.mxu1  ;;  %v1307_v38 = vpack.c.bf16 %v1303_v28, %v1303_v28  ;;  %v1308_v39 = vpack.c.bf16 %v1304_v29, %v1304_v29 }
 0x154   :  { %1577 = vmatmul.bf16.vlgmr.msrb.gmra.mxu0 %v1307_v38  ;;  %1590 = vmatmul.bf16.vlgmr.msrb.gmra.mxu1 %v1308_v39 }
 0x155   :  { %v1188_v34 = vpop.f32.mrf.mxu2  ;;  %v1201_v35 = vpop.f32.mrf.mxu3 }
 0x156   :  { %v1189_v59 = vadd.f32 %v1188_v34, %v1176_v56 }
 0x158   :  { %v1202_v37 = vadd.f32 %v1201_v35, %v1189_v59 }
 0x15d   :  { %v1190_v43 = vpop.f32.mrf.mxu2  ;;  %v1203_v44 = vpop.f32.mrf.mxu3 }
 0x169   :  { %v1214_v48 = vpop.f32.mrf.mxu0  ;;  %v1227_v49 = vpop.f32.mrf.mxu1 }
 0x16a   :  { %v1228_v60 = vadd.f32 %v1227_v49, %v1214_v48 }
 0x171   :  { %v1216_v54 = vpop.f32.mrf.mxu0  ;;  %v1229_v55 = vpop.f32.mrf.mxu1 }
 0x175   :  { %v1240_v61 = vpop.f32.mrf.mxu2  ;;  %v1253_v62 = vpop.f32.mrf.mxu3 }
 0x176   :  { %v1241_v63 = vadd.f32 %v1240_v61, %v1228_v60 }
 0x178   :  { %v1254_v2 = vadd.f32 %v1253_v62, %v1241_v63 }
 0x17a   :  { %v1258_v3 = vpack.c.bf16 %v1254_v2, %v1202_v37 }
 0x17c   :  { %v1287_v6 = vunpack.c.l.bf16 %v1258_v3  ;;  %v1288_v7 = vunpack.c.h.bf16 %v1258_v3 }
 0x17d   :  { %v1242_v8 = vpop.f32.mrf.mxu2  ;;  %v1255_v9 = vpop.f32.mrf.mxu3 }
 0x17e   :  { %v1295_v10 = vadd.f32 %v1291_v4, %v1287_v6  ;;  %v1296_v13 = vadd.f32 %v1292_v5, %v1288_v7 }
 0x180   :  { %v1305_v14 = vmax.f32 %v1295_v10, 0.0  ;;  %v1306_v15 = vmax.f32 %v1296_v13, 0.0 }
 0x182   :  { %v1309_v16 = vpack.c.bf16 %v1305_v14, %v1305_v14  ;;  %v1310_v17 = vpack.c.bf16 %v1306_v15, %v1306_v15 }
 0x184   :  { %1603 = vmatmul.bf16.vlgmr.msrb.gmra.mxu2 %v1309_v16  ;;  %1616 = vmatmul.bf16.vlgmr.msrb.gmra.mxu3 %v1310_v17 }
 0x1d1   :  { %v1578_v18 = vpop.f32.mrf.mxu0  ;;  %v1591_v19 = vpop.f32.mrf.mxu1 }
 0x1d2   :  { %v1579_v23 = vadd.f32 %v2495_v22, %v1578_v18 }
 0x1d4   :  { %v1592_v24 = vadd.f32 %v1591_v19, %v1579_v23 }
 0x1d9   :  { %v1580_v20 = vpop.f32.mrf.mxu0  ;;  %v1593_v21 = vpop.f32.mrf.mxu1 }
 0x207   :  { %v1604_v25 = vpop.f32.mrf.mxu2  ;;  %v1617_v26 = vpop.f32.mrf.mxu3 }
 0x208   :  { %v1605_v27 = vadd.f32 %v1604_v25, %v1592_v24 }
 0x20a   :  { %v1618_v28 = vadd.f32 %v1617_v26, %v1605_v27 }
 0x20c   :  { %1621 = vst [vmem:[#allocation11] sm:$0xff] %v1618_v28 }
 0x20d   :  { %1632 = dma.vmem_to_hbm [thread:$0]  %s1628_s4, 128, %s1630_s21, [#allocation4]  }
 0x20f   :  { %v1606_v29 = vpop.f32.mrf.mxu2  ;;  %v1619_v30 = vpop.f32.mrf.mxu3 }
 0x210   :  { %2646 = dma.done.wait [#allocation4], 128  }
 0x211   :  { %2647 = vsyncadd [#allocation4], 4294967168 }
 0x212   :  { %1637 = vsyncpa [#allocation3], 1 }
 0x213   :  { %1638 = vsyncpa [#allocation6], 1 }
 0x214   :  { %1639 = vsyncpa [#allocation9], 1 }
 0x215   :  { %1640 = vsyncpa [#allocation4], 1 }

</bundles_post_ra>
